<compile_context>
chip_gen: v7x
topology: tpu7x:2x2x1
jax: 0.10.0
libtpu: 0.0.40
codegen_flags: <defaults>
</compile_context>

<pallas_src>
import functools
import math

import jax
import jax.numpy as jnp
from jax import lax
from jax.experimental import pallas as pl
from jax.experimental.pallas import tpu as pltpu

_SUBLANE = 8
_LANE = 128
_MiB = 1024 * 1024

# Defensive alias (CompilerParams is current; TPUCompilerParams on older jax).
_CompilerParams = getattr(pltpu, "CompilerParams",
                          getattr(pltpu, "TPUCompilerParams", None))


def _round_up(n, m):
    return ((n + m - 1) // m) * m


def _cdiv(a, b):
    return -(-a // b)


def _vmem_capacity_bytes():
    """Best-effort physical VMEM query; conservative (v7x per-TC) fallback."""
    try:
        info = pltpu.get_tpu_info()
        cap = getattr(info, "vmem_capacity_bytes", None)
        if cap:
            return int(cap)
    except Exception:
        pass
    return 64 * _MiB


def _layer_norm_kernel(x_ref, g_ref, b_ref, o_ref, *, eps):
    # x_ref: (tr, hidden) tile (input dtype); g_ref/b_ref: (1, hidden).
    # All math is strictly per-row: a partial tail tile's garbage rows produce
    # garbage stats for garbage rows only, and their writeback is masked.
    x = x_ref[...].astype(jnp.float32)
    inv_h = 1.0 / float(x.shape[-1])                     # logical hidden size
    mean = jnp.sum(x, axis=-1, keepdims=True) * inv_h    # XLU reduction
    centered = x - mean
    var = jnp.sum(centered * centered, axis=-1, keepdims=True) * inv_h  # biased
    inv_std = lax.rsqrt(var + eps)                       # EUP slot (free-ish)
    g = g_ref[...].astype(jnp.float32)
    b = b_ref[...].astype(jnp.float32)
    # Single lane-dense store; masked only on the (rare) non-128-aligned hidden.
    o_ref[...] = (centered * inv_std * g + b).astype(o_ref.dtype)


def custom_layer_norm(x, gamma, beta, eps=1e-5):
    """LayerNorm over the trailing dims covered by gamma/beta.

    Matches torch.nn.functional.layer_norm (biased variance, eps inside sqrt).
    Supports float32 (the original module's contract) and also bf16/fp16
    activations (stats in f32, output in the input dtype).
    """
    norm_ndim = gamma.ndim
    norm_shape = x.shape[x.ndim - norm_ndim:]
    assert norm_shape == gamma.shape == beta.shape, "gamma/beta shape mismatch"

    hidden = math.prod(norm_shape)
    rows = x.size // hidden

    x2 = x.reshape(rows, hidden)
    g2 = gamma.reshape(1, hidden)
    b2 = beta.reshape(1, hidden)

    # ---- Generation-aware VMEM budget (per TensorCore). ----
    phys_vmem = _vmem_capacity_bytes()
    two_cores = phys_vmem <= 80 * _MiB          # v7x proxy: 64 MiB/TC, 2 TCs
    io_budget = 40 * _MiB if two_cores else 80 * _MiB

    # ---- Row tile: biggest whose total footprint fits the budget. ----
    # Per tile-row bytes = double-buffered in + out tiles plus ~3 f32
    # tile-sized temporaries; lane axis occupies round_up(hidden, 128) lanes
    # of VMEM even when the logical width is smaller.
    h_lanes = _round_up(hidden, _LANE)
    in_b = jnp.dtype(x.dtype).itemsize
    out_b = in_b
    bytes_per_tile_row = (2 * (in_b + out_b) + 3 * 4) * h_lanes
    tr = max(_SUBLANE, (io_budget // bytes_per_tile_row) // _SUBLANE * _SUBLANE)
    tr = min(tr, _round_up(rows, _SUBLANE))     # single (possibly partial) tile
    # TODO(synk): if hidden ever grows so large that even an 8-row tile blows
    # VMEM, add a second "arbitrary" grid axis over hidden with partial
    # sum / sum-of-squares accumulators instead of shrinking the row tile.

    num_tiles = _cdiv(rows, tr)
    # Only 2-TensorCore parts (v7x) benefit from balancing an odd grid across
    # cores; on single-TC chips halving the tile only adds per-step overhead.
    if two_cores and num_tiles > 1 and num_tiles % 2 == 1 and tr >= 2 * _SUBLANE:
        tr_half = (tr // 2) // _SUBLANE * _SUBLANE
        if tr_half >= _SUBLANE and _cdiv(rows, tr_half) % 2 == 0:
            tr = tr_half
            num_tiles = _cdiv(rows, tr)

    # Scoped-VMEM limit derived from the actual footprint (+25% headroom),
    # kept well inside physical VMEM (chiefly a v7x concern at 64 MiB/TC).
    footprint = bytes_per_tile_row * tr + 4 * h_lanes * 4  # + gamma/beta bufs
    vmem_limit = max(32 * _MiB, footprint + footprint // 4 + 2 * _MiB)
    vmem_limit = min(vmem_limit, max(phys_vmem - 8 * _MiB, 32 * _MiB))

    kernel = functools.partial(_layer_norm_kernel, eps=float(eps))

    out2 = pl.pallas_call(
        kernel,
        out_shape=jax.ShapeDtypeStruct((rows, hidden), x.dtype),
        grid_spec=pltpu.PrefetchScalarGridSpec(
            num_scalar_prefetch=0,
            grid=(num_tiles,),
            in_specs=[
                pl.BlockSpec((tr, hidden), lambda i: (i, 0)),
                pl.BlockSpec((1, hidden), lambda i: (0, 0)),
                pl.BlockSpec((1, hidden), lambda i: (0, 0)),
            ],
            out_specs=pl.BlockSpec((tr, hidden), lambda i: (i, 0)),
        ),
        compiler_params=_CompilerParams(
            dimension_semantics=("parallel",),
            vmem_limit_bytes=int(vmem_limit),
        ),
    )(x2, g2, b2)

    return out2.reshape(x.shape)


if __name__ == "__main__":
    eps = 1e-5

    def ref_ln(x, g, b, eps):
        x32 = x.astype(jnp.float32)
        mean = jnp.mean(x32, axis=-1, keepdims=True)
        var = jnp.mean((x32 - mean) ** 2, axis=-1, keepdims=True)
        y = (x32 - mean) / jnp.sqrt(var + eps) * g.astype(jnp.float32) \
            + b.astype(jnp.float32)
        return y.astype(x.dtype)

    # Typical module usage: (batch, seq, hidden), LayerNorm over hidden.
    batch, seq, hidden = 2, 8, 32
    key = jax.random.PRNGKey(0)
    x = jax.random.normal(key, (batch, seq, hidden), dtype=jnp.float32)
    gamma = jnp.ones((hidden,), dtype=jnp.float32)   # nn.Parameter(torch.ones)
    beta = jnp.zeros((hidden,), dtype=jnp.float32)   # nn.Parameter(torch.zeros)
    y = jax.block_until_ready(custom_layer_norm(x, gamma, beta, eps=eps))
    assert jnp.allclose(y, ref_ln(x, gamma, beta, eps), atol=1e-5, rtol=1e-5), \
        "mismatch vs reference (aligned shapes)"

    # Awkward shapes: rows not a multiple of 8, hidden not a multiple of 128,
    # non-trivial affine params -> exercises the partial tail row tile and the
    # unpadded, non-128-aligned lane path (no host-side pad/slice anywhere).
    k1, k2, k3 = jax.random.split(jax.random.PRNGKey(0), 3)
    xb = jax.random.normal(k1, (5, 4, 200), dtype=jnp.float32)
    gb = jax.random.normal(k2, (200,), dtype=jnp.float32)
    bb = jax.random.normal(k3, (200,), dtype=jnp.float32)
    yb = jax.block_until_ready(custom_layer_norm(xb, gb, bb, eps=eps))
    assert jnp.allclose(yb, ref_ln(xb, gb, bb, eps), atol=1e-4, rtol=1e-4), \
        "mismatch vs reference (awkward shapes)"

    # bf16 activations (traffic-halving path); stats still computed in f32.
    xc = jax.random.normal(jax.random.PRNGKey(0), (3, 8, 256)).astype(jnp.bfloat16)
    gc = jnp.ones((256,), dtype=jnp.float32)
    bc = jnp.zeros((256,), dtype=jnp.float32)
    yc = jax.block_until_ready(custom_layer_norm(xc, gc, bc, eps=eps))
    assert jnp.allclose(yc.astype(jnp.float32),
                        ref_ln(xc, gc, bc, eps).astype(jnp.float32),
                        atol=1e-1, rtol=5e-2), "mismatch vs reference (bf16)"

    print("KERNEL_OK")
</pallas_src>

<mosaic_0001>
module attributes {stable_mosaic.version = 11 : i64} {
  func.func @_layer_norm_kernel(%arg0: i32, %arg1: memref<16x32xf32, #tpu.memory_space<vmem>>, %arg2: memref<1x32xf32, #tpu.memory_space<vmem>>, %arg3: memref<1x32xf32, #tpu.memory_space<vmem>>, %arg4: memref<16x32xf32, #tpu.memory_space<vmem>>) attributes {dimension_semantics = [#tpu.dimension_semantics<parallel>], iteration_bounds = array<i64: 1>, scalar_prefetch = 0 : i64, scratch_operands = 0 : i64, tpu.core_type = #tpu.core_type<tc>, window_params = [{transform_indices = @transform_0, window_bounds = array<i64: 16, 32>}, {pipeline_mode = #tpu.pipeline_mode<synchronous>, transform_indices = @transform_1, window_bounds = array<i64: 1, 32>}, {pipeline_mode = #tpu.pipeline_mode<synchronous>, transform_indices = @transform_2, window_bounds = array<i64: 1, 32>}, {transform_indices = @transform_3, window_bounds = array<i64: 16, 32>}]} {
    %c0 = arith.constant 0 : index
    %c0_0 = arith.constant 0 : index
    %0 = vector.load %arg1[%c0, %c0_0] : memref<16x32xf32, #tpu.memory_space<vmem>>, vector<16x32xf32>
    %cst = arith.constant dense<0.000000e+00> : vector<16xf32>
    %1 = vector.multi_reduction <add>, %0, %cst [1] : vector<16x32xf32> to vector<16xf32>
    %2 = vector.shape_cast %1 : vector<16xf32> to vector<16x1xf32>
    %cst_1 = arith.constant 3.125000e-02 : f32
    %3 = vector.broadcast %cst_1 : f32 to vector<16x1xf32>
    %4 = arith.mulf %2, %3 : vector<16x1xf32>
    %5 = vector.broadcast %4 : vector<16x1xf32> to vector<16x32xf32>
    %6 = arith.subf %0, %5 : vector<16x32xf32>
    %7 = arith.mulf %6, %6 : vector<16x32xf32>
    %cst_2 = arith.constant dense<0.000000e+00> : vector<16xf32>
    %8 = vector.multi_reduction <add>, %7, %cst_2 [1] : vector<16x32xf32> to vector<16xf32>
    %9 = vector.shape_cast %8 : vector<16xf32> to vector<16x1xf32>
    %cst_3 = arith.constant 3.125000e-02 : f32
    %10 = vector.broadcast %cst_3 : f32 to vector<16x1xf32>
    %11 = arith.mulf %9, %10 : vector<16x1xf32>
    %cst_4 = arith.constant 9.99999974E-6 : f32
    %12 = vector.broadcast %cst_4 : f32 to vector<16x1xf32>
    %13 = arith.addf %11, %12 : vector<16x1xf32>
    %14 = math.rsqrt %13 : vector<16x1xf32>
    %c0_5 = arith.constant 0 : index
    %c0_6 = arith.constant 0 : index
    %15 = vector.load %arg2[%c0_5, %c0_6] : memref<1x32xf32, #tpu.memory_space<vmem>>, vector<1x32xf32>
    %c0_7 = arith.constant 0 : index
    %c0_8 = arith.constant 0 : index
    %16 = vector.load %arg3[%c0_7, %c0_8] : memref<1x32xf32, #tpu.memory_space<vmem>>, vector<1x32xf32>
    %17 = vector.broadcast %14 : vector<16x1xf32> to vector<16x32xf32>
    %18 = arith.mulf %6, %17 : vector<16x32xf32>
    %19 = vector.broadcast %15 : vector<1x32xf32> to vector<16x32xf32>
    %20 = arith.mulf %18, %19 : vector<16x32xf32>
    %21 = vector.broadcast %16 : vector<1x32xf32> to vector<16x32xf32>
    %22 = arith.addf %20, %21 : vector<16x32xf32>
    %c0_9 = arith.constant 0 : index
    %c0_10 = arith.constant 0 : index
    %23 = vector.load %arg4[%c0_9, %c0_10] : memref<16x32xf32, #tpu.memory_space<vmem>>, vector<16x32xf32>
    tpu.vector_store %arg4[%c0_9, %c0_10], %22 {strides = array<i32>} : memref<16x32xf32, #tpu.memory_space<vmem>>, vector<16x32xf32>,
    return
  }
  func.func @transform_0(%arg0: i32) -> (i32, i32) {
    %c0_i32 = arith.constant 0 : i32
    %c0_i32_0 = arith.constant 0 : i32
    return %arg0, %c0_i32 : i32, i32
  }
  func.func @transform_1(%arg0: i32) -> (i32, i32) {
    %c0_i32 = arith.constant 0 : i32
    %c0_i32_0 = arith.constant 0 : i32
    %c0_i32_1 = arith.constant 0 : i32
    return %c0_i32, %c0_i32_0 : i32, i32
  }
  func.func @transform_2(%arg0: i32) -> (i32, i32) {
    %c0_i32 = arith.constant 0 : i32
    %c0_i32_0 = arith.constant 0 : i32
    %c0_i32_1 = arith.constant 0 : i32
    return %c0_i32, %c0_i32_0 : i32, i32
  }
  func.func @transform_3(%arg0: i32) -> (i32, i32) {
    %c0_i32 = arith.constant 0 : i32
    %c0_i32_0 = arith.constant 0 : i32
    return %arg0, %c0_i32 : i32, i32
  }
}

</mosaic_0001>

<bundles_post_ra>
// kernel: tpu_custom_call.1
= control target key start
LH: loop header
LB: loop body
LE: loop exit
PB: predicated region body
PF: predicated region fallthrough
CT: control target
= control target key end

     0   :  { %8 = vsyncpa [#allocation3], 0  ;;  %s219_s0 = inlined_call_operand.hbm [shape: f32[16,32], index: 0, kind: input, shape index: {}]   ;;  %s220_s1 = inlined_call_operand.vmem [shape: f32[1,32], index: 1, kind: input, shape index: {}]   ;;  %s221_s2 = inlined_call_operand.vmem [shape: f32[1,32], index: 2, kind: input, shape index: {}]   ;;  %s222_s3 = inlined_call_operand.hbm [shape: f32[16,32], index: 3, kind: output, shape index: {}]  }
   0x1   :  { %9 = vsyncpa [#allocation4], 0  ;;  %s153_s12 = smov [#allocation2]   ;;  %s105_s16 = scalar_lea.hbm %s219_s0, 256 }
   0x2   :  { %s15_s13 = sshll.u32 %s153_s12, 4  ;;  %p106_p0 = scmp.ne.s32.totalorder %s219_s0, %s105_s16  ;;  %s16_s13 = int_to_ptr.vmem [resolvable:$true] %s15_s13 }
   0x3   :  { %p109_p1 = scmp.lt.u32.totalorder %s105_s16, %s219_s0 }
   0x5   :  { %p111_p2 = pnand %p109_p1, %p106_p0 }
   0x7   :  { %114 = shalt.err (!%p111_p2)
}
   0x8   :  { %s115_s21 = scalar_lea.vmem %s16_s13, 256  ;;  %p120_p4 = scmp.lt.s32.totalorder %s16_s13, %s16_s13 }
   0x9   :  { %p116_p3 = scmp.ne.s32.totalorder %s16_s13, %s115_s21  ;;  %p121_p5 = scmp.lt.s32.totalorder %s115_s21, %s115_s21 }
   0xb   :  { %p122_p6 = por %p121_p5, %p120_p4 }
   0xd   :  { %p123_p7 = pnand %p122_p6, %p116_p3 }
   0xf   :  { %126 = shalt.err (!%p123_p7)
}
  0x10   :  { %s154_s22 = smov 128   ;;  %s155_s23 = smov 8  }
  0x11   :  { %21 = dma.hbm_to_vmem [thread:$0]  %s219_s0, 256, %s16_s13, [#allocation3], %s154_s22, %s154_s22, %s155_s23  }
  0x12   :  { %149 = dma.done.wait [#allocation3], 256  }
  0x13   :  { %150 = vsyncadd [#allocation3], 4294967040  ;;  %vm31_vm0 = vcmask 261120   ;;  %v29_v0 = vld [vmem:[#allocation2] sm:$0xff]  ;;  %v30_v1 = vld [vmem:[#allocation2 + $0x8] sm:$0xff]  ;;  %s156_s29 = smov [#allocation5]  }
  0x14   :  { %v32_v2 = vsel %vm31_vm0, %v29_v0, 0.0  ;;  %v35_v3 = vsel %vm31_vm0, %v30_v1, 0.0  ;;  %v95_v21 = vld [vmem:[%s220_s1] ss:$0 sm:$0xff]  ;;  %s83_s30 = sshll.u32 %s156_s29, 4  ;;  %s84_s30 = int_to_ptr.vmem [resolvable:$true] %s83_s30 }
  0x15   :  { %33 = vadd.xlane.f32.xlu0 %v32_v2  ;;  %v96_v23 = vld [vmem:[%s221_s2] ss:$0 sm:$0xff]  ;;  %s127_s4 = scalar_lea.vmem %s84_s30, 256  ;;  %p132_p9 = scmp.lt.s32.totalorder %s84_s30, %s84_s30 }
  0x16   :  { %p128_p8 = scmp.ne.s32.totalorder %s84_s30, %s127_s4  ;;  %p133_p10 = scmp.lt.s32.totalorder %s127_s4, %s127_s4 }
  0x18   :  { %p134_p11 = por %p133_p10, %p132_p9 }
  0x19   :  { %36 = vadd.xlane.f32.xlu0 %v35_v3 }
  0x1a   :  { %p135_p12 = pnand %p134_p11, %p128_p8 }
  0xa2   :  { %v34_v4 = vpop.xlane.xlu0 %33 }
  0xa3   :  { %v38_v5 = vmul.f32 0.03125, %v34_v4 }
  0xa5   :  { %v40_v6 = vsub.f32 %v29_v0, %v38_v5 }
  0xa6   :  { %v37_v7 = vpop.xlane.xlu0 %36 }
  0xa7   :  { %v39_v8 = vmul.f32 0.03125, %v37_v7  ;;  %v42_v9 = vmul.f32 %v40_v6, %v40_v6 }
  0xa9   :  { %v41_v10 = vsub.f32 %v30_v1, %v39_v8  ;;  %v44_v11 = vsel %vm31_vm0, %v42_v9, 0.0 }
  0xaa   :  { %45 = vadd.xlane.f32.xlu1 %v44_v11 }
  0xab   :  { %v43_v12 = vmul.f32 %v41_v10, %v41_v10 }
  0xad   :  { %v47_v13 = vsel %vm31_vm0, %v43_v12, 0.0 }
  0xae   :  { %48 = vadd.xlane.f32.xlu1 %v47_v13 }
 0x137   :  { %v46_v14 = vpop.xlane.xlu1 %45 }
 0x138   :  { %v50_v15 = vmul.f32 0.03125, %v46_v14 }
 0x13a   :  { %v52_v16 = vadd.f32 1e-05, %v50_v15 }
 0x13b   :  { %v49_v17 = vpop.xlane.xlu1 %48 }
 0x13c   :  { %101 = vrsqrt.f32 %v52_v16  ;;  %v51_v18 = vmul.f32 0.03125, %v49_v17 }
 0x13e   :  { %v53_v19 = vadd.f32 1e-05, %v51_v18 }
 0x140   :  { %103 = vrsqrt.f32 %v53_v19 }
 0x146   :  { %v102_v20 = vpop.eup %101 }
 0x147   :  { %v58_v22 = vmul.f32 %v102_v20, %v40_v6 }
 0x149   :  { %v66_v24 = vmul.f32 %v95_v21, %v58_v22 }
 0x14a   :  { %v104_v25 = vpop.eup %103 }
 0x14b   :  { %v59_v26 = vmul.f32 %v104_v25, %v41_v10  ;;  %v74_v27 = vadd.f32 %v96_v23, %v66_v24 }
 0x14d   :  { %v67_v28 = vmul.f32 %v95_v21, %v59_v26  ;;  %76 = vst.msk [vmem:[#allocation5] sm:$0xff] %vm31_vm0, %v74_v27 }
 0x14f   :  { %v75_v29 = vadd.f32 %v96_v23, %v67_v28 }
 0x151   :  { %77 = vst.msk [vmem:[#allocation5 + $0x8] sm:$0xff] %vm31_vm0, %v75_v29 }
 0x152   :  { %138 = shalt.err (!%p135_p12)
}
 0x153   :  { %s139_s5 = scalar_lea.hbm %s222_s3, 256 }
 0x154   :  { %p140_p13 = scmp.ne.s32.totalorder %s222_s3, %s139_s5  ;;  %p143_p0 = scmp.lt.u32.totalorder %s139_s5, %s222_s3 }
 0x156   :  { %p145_p1 = pnand %p143_p0, %p140_p13 }
 0x158   :  { %148 = shalt.err (!%p145_p1)
}
 0x159   :  { %89 = dma.vmem_to_hbm [thread:$0]  %s84_s30, 256, %s222_s3, [#allocation4], %s154_s22, %s154_s22, %s155_s23  }
 0x15a   :  { %151 = dma.done.wait [#allocation4], 256  }
 0x15b   :  { %152 = vsyncadd [#allocation4], 4294967040 }
 0x15c   :  { %93 = vsyncpa [#allocation3], 1 }
 0x15d   :  { %94 = vsyncpa [#allocation4], 1 }

</bundles_post_ra>
